<compile_context>
chip_gen: v5e
topology: v5e:2x2
jax: 0.10.0
libtpu: 0.0.40
codegen_flags: <defaults>
</compile_context>

<pallas_src>
import numpy as np
import jax
import jax.numpy as jnp
from jax.experimental import pallas as pl
from jax.experimental.pallas import tpu as pltpu

BN_EPS = 1e-5
WINDOW_SIZE = 20
SENSOR_CHANNELS = 23
# (C_in, C_out, kernel_h) for the three ConvTranspose2d layers
LAYER_DEFS = [(20, 40, 5), (40, 50, 5), (50, WINDOW_SIZE // 10, 2)]
H_INS = [1, 5, 9]          # input heights per layer (output heights: 5, 9, 10)

LANE = 128
K0_PAD = 32                # layer-1 contraction pad (20 -> 32), narrow is legal & cheap
N3_PAD = 32                # layer-3 / output lane pad (20 -> 32)
TILE_M = 2048              # row tile; large to amortize per-grid-step overhead
VMEM_LIMIT = 32 * 1024 * 1024


def _round_up(n, m):
    return ((n + m - 1) // m) * m


def _use_core_parallel(num_steps):
    """CORE_PARALLEL only helps (and is only exercised) on 2-TensorCore chips."""
    try:
        kind = jax.devices()[0].device_kind.lower()
    except Exception:  # pragma: no cover
        kind = ""
    is_v7 = ("v7" in kind) or ("tpu7" in kind)
    return is_v7 and num_steps >= 2


# ----------------------------------------------------------------------------
# Pallas kernel: three fused (matmul -> +bias -> ReLU -> BN affine) stages on
# one (TILE_M, K) row tile.  Band matrices / affine rows are grid-resident.
# ----------------------------------------------------------------------------
def _demccnn_kernel(x_ref,
                    m1_ref, b1_ref, s1_ref, t1_ref,
                    m2_ref, b2_ref, s2_ref, t2_ref,
                    m3_ref, b3_ref, s3_ref, t3_ref,
                    o_ref):
    def layer(h_bf16, m_ref, b_ref, s_ref, t_ref):
        # transposed conv along H == dense matmul with a banded bf16 matrix,
        # f32 accumulation; bias + ReLU + folded BatchNorm in f32.
        y = jnp.dot(h_bf16, m_ref[...], preferred_element_type=jnp.float32)
        y = jnp.maximum(y + b_ref[...], 0.0)       # ConvTranspose2d bias + ReLU
        return y * s_ref[...] + t_ref[...]         # folded eval-mode BatchNorm2d

    h = x_ref[...]                                              # bf16 (tm, 32)
    h = layer(h, m1_ref, b1_ref, s1_ref, t1_ref).astype(jnp.bfloat16)
    h = layer(h, m2_ref, b2_ref, s2_ref, t2_ref).astype(jnp.bfloat16)
    o_ref[...] = layer(h, m3_ref, b3_ref, s3_ref, t3_ref)       # f32 (tm, 32)


def demccnn_forward(x, packed_params, tile_m=TILE_M):
    """x: (B, 20, sensor_channels) f32 -> noise (B, sensor_channels, window_size)."""
    B, C0, W = x.shape
    assert C0 == 20 and W == SENSOR_CHANNELS

    (m1, b1, s1, t1,
     m2, b2, s2, t2,
     m3, b3, s3, t3) = packed_params
    k_pad = m1.shape[0]        # 32   (padded C_in*H_in of layer 1)
    n_pad = m3.shape[1]        # 32   (padded C_out*H_out of layer 3)

    # rows = (b, w); cols = (c, h) with H_in = 1 -> (M, 20) bf16, padded to 32 lanes.
    # TODO(synk): produce x already as a lane-dense bf16 (M, 32) slab upstream to
    # avoid this transpose/pad pass entirely.
    M = B * W
    x2d = jnp.transpose(x, (0, 2, 1)).reshape(M, C0).astype(jnp.bfloat16)

    tm = min(tile_m, _round_up(M, 16))               # bf16 sublane-aligned row tile
    m_pad = _round_up(M, tm)                         # every grid tile is full
    x_pad = jnp.zeros((m_pad, k_pad), jnp.bfloat16).at[:M, :C0].set(x2d)

    num_steps = pl.cdiv(m_pad, tm)
    grid = (num_steps,)
    row_spec = lambda width: pl.BlockSpec((tm, width), lambda i: (i, 0))   # streamed
    res_spec = lambda arr: pl.BlockSpec(arr.shape, lambda i: (0, 0))       # resident

    if _use_core_parallel(num_steps):
        dim_sem = (pltpu.CORE_PARALLEL,)             # split M tiles across v7x's 2 TCs
    else:
        dim_sem = ("parallel",)

    y = pl.pallas_call(
        _demccnn_kernel,
        out_shape=jax.ShapeDtypeStruct((m_pad, n_pad), jnp.float32),
        grid=grid,
        in_specs=[row_spec(k_pad),
                  res_spec(m1), res_spec(b1), res_spec(s1), res_spec(t1),
                  res_spec(m2), res_spec(b2), res_spec(s2), res_spec(t2),
                  res_spec(m3), res_spec(b3), res_spec(s3), res_spec(t3)],
        out_specs=row_spec(n_pad),
        compiler_params=pltpu.CompilerParams(
            dimension_semantics=dim_sem,
            vmem_limit_bytes=VMEM_LIMIT),
    )(x_pad, m1, b1, s1, t1, m2, b2, s2, t2, m3, b3, s3, t3)

    # drop padding; rows = (b, w), cols = (c3, h3)  ->  NCHW (B, 2, 10, W)
    # NOTE: padded rows beyond M are non-zero (relu(bias)*scale+shift); never
    # consume y beyond [:M].
    C3 = LAYER_DEFS[-1][1]
    H3 = H_INS[-1] + LAYER_DEFS[-1][2] - 1
    y_real = y[:M, :C3 * H3]
    y_nchw = jnp.transpose(y_real.reshape(B, W, C3, H3), (0, 2, 3, 1))
    # PyTorch: .reshape(B, sensor_channels, window_size) on contiguous NCHW
    return y_nchw.reshape(B, SENSOR_CHANNELS, WINDOW_SIZE)


# ----------------------------------------------------------------------------
# Parameter construction (deterministic) + packing into lane-padded matmul form.
# ----------------------------------------------------------------------------
def _build_band_matrix(w, h_in):
    """w: (C_in, C_out, K) ConvTranspose weight (width-1 axis squeezed)."""
    c_in, c_out, k = w.shape
    h_out = h_in + k - 1
    m = np.zeros((c_in * h_in, c_out * h_out), dtype=np.float32)
    for i in range(c_in):
        for h in range(h_in):
            for o in range(c_out):
                for kh in range(k):
                    m[i * h_in + h, o * h_out + (h + kh)] = w[i, o, kh]
    return m


def init_params(key):
    raw, packed = [], []
    n_layers = len(LAYER_DEFS)
    in_pad = _round_up(LAYER_DEFS[0][0] * H_INS[0], K0_PAD)      # 20 -> 32
    for li, ((c_in, c_out, k), h_in) in enumerate(zip(LAYER_DEFS, H_INS)):
        key, kw, kb, kg, kbt, km, kv = jax.random.split(key, 7)
        w = 0.1 * jax.random.normal(kw, (c_in, c_out, k), jnp.float32)
        b = 0.1 * jax.random.normal(kb, (c_out,), jnp.float32)
        gamma = 1.0 + 0.1 * jax.random.normal(kg, (c_out,), jnp.float32)
        beta = 0.1 * jax.random.normal(kbt, (c_out,), jnp.float32)
        r_mean = 0.1 * jax.random.normal(km, (c_out,), jnp.float32)
        r_var = jax.random.uniform(kv, (c_out,), jnp.float32, 0.5, 1.5)

        w_np, b_np = np.asarray(w), np.asarray(b)
        g_np, bt_np = np.asarray(gamma), np.asarray(beta)
        m_np, v_np = np.asarray(r_mean), np.asarray(r_var)
        raw.append((w_np, b_np, g_np, bt_np, m_np, v_np))

        h_out = h_in + k - 1
        n_real = c_out * h_out
        is_last = li == n_layers - 1
        out_pad = _round_up(n_real, N3_PAD if is_last else LANE)  # 256 / 512 / 32

        band = _build_band_matrix(w_np, h_in)                # (C_in*H_in, n_real)
        band_pad = np.zeros((in_pad, out_pad), np.float32)   # zero pad rows/cols
        band_pad[:band.shape[0], :n_real] = band

        scale = g_np / np.sqrt(v_np + BN_EPS)
        shift = bt_np - m_np * scale
        bias_row = np.zeros((1, out_pad), np.float32)
        scale_row = np.zeros((1, out_pad), np.float32)       # 0 in padded lanes -> output 0
        shift_row = np.zeros((1, out_pad), np.float32)
        bias_row[0, :n_real] = np.repeat(b_np, h_out)
        scale_row[0, :n_real] = np.repeat(scale, h_out)
        shift_row[0, :n_real] = np.repeat(shift, h_out)

        packed += [jnp.asarray(band_pad, jnp.bfloat16),       # bf16 MXU operands
                   jnp.asarray(bias_row), jnp.asarray(scale_row), jnp.asarray(shift_row)]
        in_pad = out_pad                                      # next layer's padded K
    return raw, tuple(packed)


# ----------------------------------------------------------------------------
# Pure-numpy reference (explicit transposed conv, NCHW, full f32) for verification.
# ----------------------------------------------------------------------------
def ref_forward(x_np, raw_params):
    B = x_np.shape[0]
    h = x_np.reshape(B, 20, 1, SENSOR_CHANNELS).astype(np.float32)
    for (w, b, gamma, beta, mean, var) in raw_params:
        c_in, c_out, k = w.shape
        _, _, H, W = h.shape
        out = np.zeros((B, c_out, H + k - 1, W), dtype=np.float32)
        out += b[None, :, None, None]
        for kh in range(k):
            out[:, :, kh:kh + H, :] += np.einsum('bihw,io->bohw', h, w[:, :, kh])
        out = np.maximum(out, 0.0)
        out = (out - mean[None, :, None, None]) / np.sqrt(var[None, :, None, None] + BN_EPS)
        out = out * gamma[None, :, None, None] + beta[None, :, None, None]
        h = out
    return h.reshape(B, SENSOR_CHANNELS, WINDOW_SIZE)


if __name__ == "__main__":
    key = jax.random.PRNGKey(0)
    key, kx, kp = jax.random.split(key, 3)

    B = 2
    x = jax.random.normal(kx, (B, 20, SENSOR_CHANNELS), jnp.float32)

    raw_params, packed_params = init_params(kp)

    fwd = jax.jit(lambda xx: demccnn_forward(xx, packed_params))
    noise = jax.block_until_ready(fwd(x))

    expected = ref_forward(np.asarray(x), raw_params)
    # bf16 MXU operands / bf16 inter-layer activations with f32 accumulation,
    # stacked across three layers -> loosened tolerance vs. the full-f32 reference.
    np.testing.assert_allclose(np.asarray(noise), expected, rtol=5e-2, atol=5e-2)
    assert noise.shape == (B, SENSOR_CHANNELS, WINDOW_SIZE)

    print("KERNEL_OK")
</pallas_src>

<mosaic_0001>
module attributes {stable_mosaic.version = 11 : i64} {
  func.func @_demccnn_kernel(%arg0: i32, %arg1: memref<48x32xbf16, #tpu.memory_space<vmem>>, %arg2: memref<32x256xbf16, #tpu.memory_space<vmem>>, %arg3: memref<1x256xf32, #tpu.memory_space<vmem>>, %arg4: memref<1x256xf32, #tpu.memory_space<vmem>>, %arg5: memref<1x256xf32, #tpu.memory_space<vmem>>, %arg6: memref<256x512xbf16, #tpu.memory_space<vmem>>, %arg7: memref<1x512xf32, #tpu.memory_space<vmem>>, %arg8: memref<1x512xf32, #tpu.memory_space<vmem>>, %arg9: memref<1x512xf32, #tpu.memory_space<vmem>>, %arg10: memref<512x32xbf16, #tpu.memory_space<vmem>>, %arg11: memref<1x32xf32, #tpu.memory_space<vmem>>, %arg12: memref<1x32xf32, #tpu.memory_space<vmem>>, %arg13: memref<1x32xf32, #tpu.memory_space<vmem>>, %arg14: memref<48x32xf32, #tpu.memory_space<vmem>>) attributes {dimension_semantics = [#tpu.dimension_semantics<parallel>], iteration_bounds = array<i64: 1>, scalar_prefetch = 0 : i64, scratch_operands = 0 : i64, tpu.core_type = #tpu.core_type<tc>, window_params = [{transform_indices = @transform_0, window_bounds = array<i64: 48, 32>}, {pipeline_mode = #tpu.pipeline_mode<synchronous>, transform_indices = @transform_1, window_bounds = array<i64: 32, 256>}, {pipeline_mode = #tpu.pipeline_mode<synchronous>, transform_indices = @transform_2, window_bounds = array<i64: 1, 256>}, {pipeline_mode = #tpu.pipeline_mode<synchronous>, transform_indices = @transform_3, window_bounds = array<i64: 1, 256>}, {pipeline_mode = #tpu.pipeline_mode<synchronous>, transform_indices = @transform_4, window_bounds = array<i64: 1, 256>}, {pipeline_mode = #tpu.pipeline_mode<synchronous>, transform_indices = @transform_5, window_bounds = array<i64: 256, 512>}, {pipeline_mode = #tpu.pipeline_mode<synchronous>, transform_indices = @transform_6, window_bounds = array<i64: 1, 512>}, {pipeline_mode = #tpu.pipeline_mode<synchronous>, transform_indices = @transform_7, window_bounds = array<i64: 1, 512>}, {pipeline_mode = #tpu.pipeline_mode<synchronous>, transform_indices = @transform_8, window_bounds = array<i64: 1, 512>}, {pipeline_mode = #tpu.pipeline_mode<synchronous>, transform_indices = @transform_9, window_bounds = array<i64: 512, 32>}, {pipeline_mode = #tpu.pipeline_mode<synchronous>, transform_indices = @transform_10, window_bounds = array<i64: 1, 32>}, {pipeline_mode = #tpu.pipeline_mode<synchronous>, transform_indices = @transform_11, window_bounds = array<i64: 1, 32>}, {pipeline_mode = #tpu.pipeline_mode<synchronous>, transform_indices = @transform_12, window_bounds = array<i64: 1, 32>}, {transform_indices = @transform_13, window_bounds = array<i64: 48, 32>}]} {
    %c0 = arith.constant 0 : index
    %c0_0 = arith.constant 0 : index
    %0 = vector.load %arg1[%c0, %c0_0] : memref<48x32xbf16, #tpu.memory_space<vmem>>, vector<48x32xbf16>
    %c0_1 = arith.constant 0 : index
    %c0_2 = arith.constant 0 : index
    %1 = vector.load %arg2[%c0_1, %c0_2] : memref<32x256xbf16, #tpu.memory_space<vmem>>, vector<32x256xbf16>
    %cst = arith.constant dense<0.000000e+00> : vector<48x256xf32>
    %2 = tpu.matmul %0, %1, %cst {dimension_numbers = #tpu.dot_dimension_numbers<[1], [0], [0], [1], [0, 0, 1, 1], [], []>} : vector<48x32xbf16>, vector<32x256xbf16>, vector<48x256xf32> -> vector<48x256xf32>
    %c0_3 = arith.constant 0 : index
    %c0_4 = arith.constant 0 : index
    %3 = vector.load %arg3[%c0_3, %c0_4] : memref<1x256xf32, #tpu.memory_space<vmem>>, vector<1x256xf32>
    %4 = vector.broadcast %3 : vector<1x256xf32> to vector<48x256xf32>
    %5 = arith.addf %2, %4 : vector<48x256xf32>
    %cst_5 = arith.constant 0.000000e+00 : f32
    %6 = vector.broadcast %cst_5 : f32 to vector<48x256xf32>
    %7 = arith.maximumf %5, %6 : vector<48x256xf32>
    %c0_6 = arith.constant 0 : index
    %c0_7 = arith.constant 0 : index
    %8 = vector.load %arg4[%c0_6, %c0_7] : memref<1x256xf32, #tpu.memory_space<vmem>>, vector<1x256xf32>
    %9 = vector.broadcast %8 : vector<1x256xf32> to vector<48x256xf32>
    %10 = arith.mulf %7, %9 : vector<48x256xf32>
    %c0_8 = arith.constant 0 : index
    %c0_9 = arith.constant 0 : index
    %11 = vector.load %arg5[%c0_8, %c0_9] : memref<1x256xf32, #tpu.memory_space<vmem>>, vector<1x256xf32>
    %12 = vector.broadcast %11 : vector<1x256xf32> to vector<48x256xf32>
    %13 = arith.addf %10, %12 : vector<48x256xf32>
    %14 = arith.truncf %13 : vector<48x256xf32> to vector<48x256xbf16>
    %c0_10 = arith.constant 0 : index
    %c0_11 = arith.constant 0 : index
    %15 = vector.load %arg6[%c0_10, %c0_11] : memref<256x512xbf16, #tpu.memory_space<vmem>>, vector<256x512xbf16>
    %cst_12 = arith.constant dense<0.000000e+00> : vector<48x512xf32>
    %16 = tpu.matmul %14, %15, %cst_12 {dimension_numbers = #tpu.dot_dimension_numbers<[1], [0], [0], [1], [0, 0, 1, 1], [], []>} : vector<48x256xbf16>, vector<256x512xbf16>, vector<48x512xf32> -> vector<48x512xf32>
    %c0_13 = arith.constant 0 : index
    %c0_14 = arith.constant 0 : index
    %17 = vector.load %arg7[%c0_13, %c0_14] : memref<1x512xf32, #tpu.memory_space<vmem>>, vector<1x512xf32>
    %18 = vector.broadcast %17 : vector<1x512xf32> to vector<48x512xf32>
    %19 = arith.addf %16, %18 : vector<48x512xf32>
    %cst_15 = arith.constant 0.000000e+00 : f32
    %20 = vector.broadcast %cst_15 : f32 to vector<48x512xf32>
    %21 = arith.maximumf %19, %20 : vector<48x512xf32>
    %c0_16 = arith.constant 0 : index
    %c0_17 = arith.constant 0 : index
    %22 = vector.load %arg8[%c0_16, %c0_17] : memref<1x512xf32, #tpu.memory_space<vmem>>, vector<1x512xf32>
    %23 = vector.broadcast %22 : vector<1x512xf32> to vector<48x512xf32>
    %24 = arith.mulf %21, %23 : vector<48x512xf32>
    %c0_18 = arith.constant 0 : index
    %c0_19 = arith.constant 0 : index
    %25 = vector.load %arg9[%c0_18, %c0_19] : memref<1x512xf32, #tpu.memory_space<vmem>>, vector<1x512xf32>
    %26 = vector.broadcast %25 : vector<1x512xf32> to vector<48x512xf32>
    %27 = arith.addf %24, %26 : vector<48x512xf32>
    %28 = arith.truncf %27 : vector<48x512xf32> to vector<48x512xbf16>
    %c0_20 = arith.constant 0 : index
    %c0_21 = arith.constant 0 : index
    %29 = vector.load %arg10[%c0_20, %c0_21] : memref<512x32xbf16, #tpu.memory_space<vmem>>, vector<512x32xbf16>
    %cst_22 = arith.constant dense<0.000000e+00> : vector<48x32xf32>
    %30 = tpu.matmul %28, %29, %cst_22 {dimension_numbers = #tpu.dot_dimension_numbers<[1], [0], [0], [1], [0, 0, 1, 1], [], []>} : vector<48x512xbf16>, vector<512x32xbf16>, vector<48x32xf32> -> vector<48x32xf32>
    %c0_23 = arith.constant 0 : index
    %c0_24 = arith.constant 0 : index
    %31 = vector.load %arg11[%c0_23, %c0_24] : memref<1x32xf32, #tpu.memory_space<vmem>>, vector<1x32xf32>
    %32 = vector.broadcast %31 : vector<1x32xf32> to vector<48x32xf32>
    %33 = arith.addf %30, %32 : vector<48x32xf32>
    %cst_25 = arith.constant 0.000000e+00 : f32
    %34 = vector.broadcast %cst_25 : f32 to vector<48x32xf32>
    %35 = arith.maximumf %33, %34 : vector<48x32xf32>
    %c0_26 = arith.constant 0 : index
    %c0_27 = arith.constant 0 : index
    %36 = vector.load %arg12[%c0_26, %c0_27] : memref<1x32xf32, #tpu.memory_space<vmem>>, vector<1x32xf32>
    %37 = vector.broadcast %36 : vector<1x32xf32> to vector<48x32xf32>
    %38 = arith.mulf %35, %37 : vector<48x32xf32>
    %c0_28 = arith.constant 0 : index
    %c0_29 = arith.constant 0 : index
    %39 = vector.load %arg13[%c0_28, %c0_29] : memref<1x32xf32, #tpu.memory_space<vmem>>, vector<1x32xf32>
    %40 = vector.broadcast %39 : vector<1x32xf32> to vector<48x32xf32>
    %41 = arith.addf %38, %40 : vector<48x32xf32>
    %c0_30 = arith.constant 0 : index
    %c0_31 = arith.constant 0 : index
    %42 = vector.load %arg14[%c0_30, %c0_31] : memref<48x32xf32, #tpu.memory_space<vmem>>, vector<48x32xf32>
    tpu.vector_store %arg14[%c0_30, %c0_31], %41 {strides = array<i32>} : memref<48x32xf32, #tpu.memory_space<vmem>>, vector<48x32xf32>,
    return
  }
  func.func @transform_0(%arg0: i32) -> (i32, i32) {
    %c0_i32 = arith.constant 0 : i32
    %c0_i32_0 = arith.constant 0 : i32
    return %arg0, %c0_i32 : i32, i32
  }
  func.func @transform_1(%arg0: i32) -> (i32, i32) {
    %c0_i32 = arith.constant 0 : i32
    %c0_i32_0 = arith.constant 0 : i32
    %c0_i32_1 = arith.constant 0 : i32
    return %c0_i32, %c0_i32_0 : i32, i32
  }
  func.func @transform_2(%arg0: i32) -> (i32, i32) {
    %c0_i32 = arith.constant 0 : i32
    %c0_i32_0 = arith.constant 0 : i32
    %c0_i32_1 = arith.constant 0 : i32
    return %c0_i32, %c0_i32_0 : i32, i32
  }
  func.func @transform_3(%arg0: i32) -> (i32, i32) {
    %c0_i32 = arith.constant 0 : i32
    %c0_i32_0 = arith.constant 0 : i32
    %c0_i32_1 = arith.constant 0 : i32
    return %c0_i32, %c0_i32_0 : i32, i32
  }
  func.func @transform_4(%arg0: i32) -> (i32, i32) {
    %c0_i32 = arith.constant 0 : i32
    %c0_i32_0 = arith.constant 0 : i32
    %c0_i32_1 = arith.constant 0 : i32
    return %c0_i32, %c0_i32_0 : i32, i32
  }
  func.func @transform_5(%arg0: i32) -> (i32, i32) {
    %c0_i32 = arith.constant 0 : i32
    %c0_i32_0 = arith.constant 0 : i32
    %c0_i32_1 = arith.constant 0 : i32
    return %c0_i32, %c0_i32_0 : i32, i32
  }
  func.func @transform_6(%arg0: i32) -> (i32, i32) {
    %c0_i32 = arith.constant 0 : i32
    %c0_i32_0 = arith.constant 0 : i32
    %c0_i32_1 = arith.constant 0 : i32
    return %c0_i32, %c0_i32_0 : i32, i32
  }
  func.func @transform_7(%arg0: i32) -> (i32, i32) {
    %c0_i32 = arith.constant 0 : i32
    %c0_i32_0 = arith.constant 0 : i32
    %c0_i32_1 = arith.constant 0 : i32
    return %c0_i32, %c0_i32_0 : i32, i32
  }
  func.func @transform_8(%arg0: i32) -> (i32, i32) {
    %c0_i32 = arith.constant 0 : i32
    %c0_i32_0 = arith.constant 0 : i32
    %c0_i32_1 = arith.constant 0 : i32
    return %c0_i32, %c0_i32_0 : i32, i32
  }
  func.func @transform_9(%arg0: i32) -> (i32, i32) {
    %c0_i32 = arith.constant 0 : i32
    %c0_i32_0 = arith.constant 0 : i32
    %c0_i32_1 = arith.constant 0 : i32
    return %c0_i32, %c0_i32_0 : i32, i32
  }
  func.func @transform_10(%arg0: i32) -> (i32, i32) {
    %c0_i32 = arith.constant 0 : i32
    %c0_i32_0 = arith.constant 0 : i32
    %c0_i32_1 = arith.constant 0 : i32
    return %c0_i32, %c0_i32_0 : i32, i32
  }
  func.func @transform_11(%arg0: i32) -> (i32, i32) {
    %c0_i32 = arith.constant 0 : i32
    %c0_i32_0 = arith.constant 0 : i32
    %c0_i32_1 = arith.constant 0 : i32
    return %c0_i32, %c0_i32_0 : i32, i32
  }
  func.func @transform_12(%arg0: i32) -> (i32, i32) {
    %c0_i32 = arith.constant 0 : i32
    %c0_i32_0 = arith.constant 0 : i32
    %c0_i32_1 = arith.constant 0 : i32
    return %c0_i32, %c0_i32_0 : i32, i32
  }
  func.func @transform_13(%arg0: i32) -> (i32, i32) {
    %c0_i32 = arith.constant 0 : i32
    %c0_i32_0 = arith.constant 0 : i32
    return %arg0, %c0_i32 : i32, i32
  }
}

</mosaic_0001>

<bundles_post_ra>
// kernel: _lambda_.1
= control target key start
LH: loop header
LB: loop body
LE: loop exit
PB: predicated region body
PF: predicated region fallthrough
CT: control target
= control target key end

     0   :  { %18 = vsyncpa [#allocation3], 0  ;;  %s2262_s0 = inlined_call_operand.vmem [shape: bf16[48,32], index: 0, kind: input, shape index: {}]   ;;  %s2263_s1 = inlined_call_operand.vmem [shape: bf16[32,256], index: 1, kind: input, shape index: {}]   ;;  %s2264_s2 = inlined_call_operand.vmem [shape: f32[1,256], index: 2, kind: input, shape index: {}]   ;;  %s2265_s3 = inlined_call_operand.vmem [shape: f32[1,256], index: 3, kind: input, shape index: {}]   ;;  %s2266_s4 = inlined_call_operand.vmem [shape: f32[1,256], index: 4, kind: input, shape index: {}]   ;;  %s2267_s5 = inlined_call_operand.hbm [shape: bf16[256,512], index: 5, kind: input, shape index: {}]   ;;  %s2268_s6 = inlined_call_operand.vmem [shape: f32[1,512], index: 6, kind: input, shape index: {}]   ;;  %s2269_s7 = inlined_call_operand.vmem [shape: f32[1,512], index: 7, kind: input, shape index: {}]   ;;  %s2270_s8 = inlined_call_operand.vmem [shape: f32[1,512], index: 8, kind: input, shape index: {}]   ;;  %s2271_s9 = inlined_call_operand.hbm [shape: bf16[512,32], index: 9, kind: input, shape index: {}]   ;;  %s2272_s10 = inlined_call_operand.vmem [shape: f32[1,32], index: 10, kind: input, shape index: {}]   ;;  %s2273_s11 = inlined_call_operand.vmem [shape: f32[1,32], index: 11, kind: input, shape index: {}]   ;;  %s2274_s12 = inlined_call_operand.vmem [shape: f32[1,32], index: 12, kind: input, shape index: {}]   ;;  %s2275_s13 = inlined_call_operand.vmem [shape: f32[48,32], index: 13, kind: output, shape index: {}]  }
   0x1   :  { %s34_s27 = sshll.u32 %s2267_s5, 4  ;;  %s35_s27 = int_to_ptr.hbm [resolvable:$true] %s34_s27 }
   0x2   :  { %19 = vsyncpa [#allocation5], 0  ;;  %s1910_s28 = smov [#allocation2]   ;;  %s53_s15 = sshll.u32 %s2271_s9, 4  ;;  %s54_s15 = int_to_ptr.hbm [resolvable:$true] %s53_s15 }
   0x3   :  { %s36_s29 = sshll.u32 %s1910_s28, 4  ;;  %s1911_s16 = smov 256   ;;  %s37_s29 = int_to_ptr.vmem [resolvable:$true] %s36_s29 }
   0x4   :  { %s1912_s17 = smov 16   ;;  %s1913_s18 = smov [#allocation4]  }
   0x5   :  { %42 = dma.hbm_to_vmem [thread:$0]  %s35_s27, 8192, %s37_s29, [#allocation3], %s1911_s16, %s1911_s16, %s1912_s17  }
   0x6   :  { %s55_s19 = sshll.u32 %s1913_s18, 4  ;;  %s1914_s20 = smov 64   ;;  %s56_s19 = int_to_ptr.vmem [resolvable:$true] %s55_s19 }
   0x7   :  { %s1915_s21 = smov 4  }
   0x8   :  { %61 = dma.hbm_to_vmem [thread:$0]  %s54_s15, 4096, %s56_s19, [#allocation5], %s1914_s20, %s1914_s20, %s1915_s21  }
   0x9   :  { %1906 = dma.done.wait [#allocation3], 8192  }
   0xa   :  { %1907 = vsyncadd [#allocation3], 4294959104 }
   0xb   :  { %1908 = dma.done.wait [#allocation5], 4096  }
   0xc   :  { %1909 = vsyncadd [#allocation5], 4294963200  ;;  %v1346_v0 = vld [vmem:[%s2263_s1 + $0x10] sm:$0xf]  ;;  %v1748_v1 = vld [vmem:[%s2263_s1 + $0x14] sm:$0xf0] }
   0xd   :  { %v1747_v2 = vld [vmem:[%s2263_s1 + $0x14] sm:$0xf]  ;;  %v1347_v3 = vor.u32 %v1748_v1, %v1346_v0  ;;  %v1348_v4 = vld [vmem:[%s2263_s1 + $0x18] sm:$0xf0]  ;;  %v1338_v5 = vld [vmem:[%s2263_s1] sm:$0xf] }
   0xe   :  { %v1746_v6 = vld [vmem:[%s2263_s1 + $0x4] sm:$0xf0]  ;;  %v1351_v7 = vor.u32 %v1747_v2, %v1348_v4  ;;  %v1745_v8 = vld [vmem:[%s2263_s1 + $0x4] sm:$0xf]  ;;  %v1340_v9 = vld [vmem:[%s2263_s1 + $0x8] sm:$0xf0] }
   0xf   :  { %144 = vmatpush.bf16.msra.mxu0 %v1347_v3  ;;  %v1339_v10 = vor.u32 %v1746_v6, %v1338_v5  ;;  %1845 = vmatpush.bf16.msra.mxu2 %v1347_v3  ;;  %v1472_v11 = vld [vmem:[#allocation2 + $0xe0] sm:$0xf]  ;;  %v1343_v12 = vor.u32 %v1745_v8, %v1340_v9  ;;  %v1744_v14 = vld [vmem:[%s2262_s0 + $0x10] sm:$0xff]  ;;  %v1777_v20 = vld [vmem:[#allocation2 + $0xe4] sm:$0xf]  ;;  %vm128_vm0 = vcmask 261120  }
  0x10   :  { %168 = vmatpush.bf16.msra.mxu1 %v1351_v7  ;;  %v1742_v13 = vld [vmem:[%s2262_s0] sm:$0xff]  ;;  %1847 = vmatpush.bf16.msra.mxu3 %v1351_v7  ;;  %v1779_v15 = vld [vmem:[#allocation2 + $0xec] sm:$0xf0]  ;;  %v1474_v21 = vld [vmem:[#allocation2 + $0xf0] sm:$0xf0] }
  0x11   :  { %v1600_v16 = vld [vmem:[#allocation2 + $0x1e0] sm:$0xf]  ;;  %v1811_v17 = vld [vmem:[#allocation2 + $0x1ec] sm:$0xf0]  ;;  %v1473_v18 = vor.u32 %v1779_v15, %v1472_v11  ;;  %v1809_v22 = vld [vmem:[#allocation2 + $0x1e4] sm:$0xf]  ;;  %v1477_v28 = vor.u32 %v1777_v20, %v1474_v21 }
  0x12   :  { %v1601_v19 = vor.u32 %v1811_v17, %v1600_v16  ;;  %v1602_v23 = vld [vmem:[#allocation2 + $0x1f0] sm:$0xf0]  ;;  %v1456_v24 = vld [vmem:[#allocation2 + $0xc0] sm:$0xf]  ;;  %v1775_v25 = vld [vmem:[#allocation2 + $0xcc] sm:$0xf0] }
  0x13   :  { %145 = vmatpush.bf16.msra.mxu0 %v1339_v10  ;;  %1846 = vmatpush.bf16.msra.mxu2 %v1339_v10  ;;  %v1584_v26 = vld [vmem:[#allocation2 + $0x1c0] sm:$0xf]  ;;  %v1807_v27 = vld [vmem:[#allocation2 + $0x1cc] sm:$0xf0]  ;;  %v1605_v29 = vor.u32 %v1809_v22, %v1602_v23  ;;  %v1773_v30 = vld [vmem:[#allocation2 + $0xc4] sm:$0xf]  ;;  %v1457_v32 = vor.u32 %v1775_v25, %v1456_v24 }
  0x14   :  { %169 = vmatpush.bf16.msra.mxu1 %v1343_v12  ;;  %1848 = vmatpush.bf16.msra.mxu3 %v1343_v12  ;;  %v1458_v31 = vld [vmem:[#allocation2 + $0xd0] sm:$0xf0]  ;;  %v1585_v33 = vor.u32 %v1807_v27, %v1584_v26  ;;  %v1805_v34 = vld [vmem:[#allocation2 + $0x1c4] sm:$0xf]  ;;  %v1440_v36 = vld [vmem:[#allocation2 + $0xa0] sm:$0xf] }
  0x15   :  { %v1586_v35 = vld [vmem:[#allocation2 + $0x1d0] sm:$0xf0]  ;;  %v1771_v37 = vld [vmem:[#allocation2 + $0xac] sm:$0xf0]  ;;  %v1568_v38 = vld [vmem:[#allocation2 + $0x1a0] sm:$0xf]  ;;  %v1461_v41 = vor.u32 %v1773_v30, %v1458_v31 }
  0x16   :  { %1352 = vmatmul.msk.bf16.vlgmr.msra.gmra.mxu0 %vm128_vm0, %v1742_v13  ;;  %1354 = vmatmul.msk.bf16.vlgmr.msra.gmra.mxu2 %vm128_vm0, %v1744_v14  ;;  %v1803_v39 = vld [vmem:[#allocation2 + $0x1ac] sm:$0xf0]  ;;  %v1769_v40 = vld [vmem:[#allocation2 + $0xa4] sm:$0xf]  ;;  %v1589_v42 = vor.u32 %v1805_v34, %v1586_v35  ;;  %v1442_v43 = vld [vmem:[#allocation2 + $0xb0] sm:$0xf0]  ;;  %v1441_v44 = vor.u32 %v1771_v37, %v1440_v36 }
  0x17   :  { %634 = vmatpush.bf16.msrb.mxu2 %v1473_v18  ;;  %1355 = vmatmul.msk.bf16.vlgmr.msra.gmra.mxu1 %vm128_vm0, %v1742_v13  ;;  %v1569_v45 = vor.u32 %v1803_v39, %v1568_v38  ;;  %v1801_v46 = vld [vmem:[#allocation2 + $0x1a4] sm:$0xf]  ;;  %v1570_v47 = vld [vmem:[#allocation2 + $0x1b0] sm:$0xf0]  ;;  %v1445_v48 = vor.u32 %v1769_v40, %v1442_v43  ;;  %v1743_v50 = vld [vmem:[%s2262_s0 + $0x8] sm:$0xff] }
  0x18   :  { %658 = vmatpush.bf16.msrb.mxu3 %v1601_v19  ;;  %682 = vmatpush.bf16.msrb.mxu0 %v1477_v28  ;;  %v1573_v49 = vor.u32 %v1801_v46, %v1570_v47  ;;  %v1424_v51 = vld [vmem:[#allocation2 + $0x80] sm:$0xf]  ;;  %v1767_v52 = vld [vmem:[#allocation2 + $0x8c] sm:$0xf0]  ;;  %v1765_v56 = vld [vmem:[#allocation2 + $0x84] sm:$0xf] }
  0x19   :  { %1357 = vmatmul.msk.bf16.vlgmr.msra.gmra.mxu3 %vm128_vm0, %v1744_v14  ;;  %706 = vmatpush.bf16.msrb.mxu1 %v1605_v29  ;;  %v1552_v53 = vld [vmem:[#allocation2 + $0x180] sm:$0xf]  ;;  %v1425_v54 = vor.u32 %v1767_v52, %v1424_v51  ;;  %v1799_v55 = vld [vmem:[#allocation2 + $0x18c] sm:$0xf0]  ;;  %v1426_v57 = vld [vmem:[#allocation2 + $0x90] sm:$0xf0] }
  0x1a   :  { %v1553_v58 = vor.u32 %v1799_v55, %v1552_v53  ;;  %v1429_v59 = vor.u32 %v1765_v56, %v1426_v57  ;;  %v1797_v60 = vld [vmem:[#allocation2 + $0x184] sm:$0xf]  ;;  %v1554_v61 = vld [vmem:[#allocation2 + $0x190] sm:$0xf0]  ;;  %v1408_v63 = vld [vmem:[#allocation2 + $0x60] sm:$0xf] }
  0x1b   :  { %635 = vmatpush.bf16.msrb.mxu2 %v1457_v32  ;;  %v1557_v62 = vor.u32 %v1797_v60, %v1554_v61  ;;  %v1763_v0 = vld [vmem:[#allocation2 + $0x6c] sm:$0xf0]  ;;  %v1536_v2 = vld [vmem:[#allocation2 + $0x160] sm:$0xf]  ;;  %v1761_v5 = vld [vmem:[#allocation2 + $0x64] sm:$0xf] }
  0x1c   :  { %659 = vmatpush.bf16.msrb.mxu3 %v1585_v33  ;;  %683 = vmatpush.bf16.msrb.mxu0 %v1461_v41  ;;  %v1409_v1 = vor.u32 %v1763_v0, %v1408_v63  ;;  %v1795_v3 = vld [vmem:[#allocation2 + $0x16c] sm:$0xf0]  ;;  %v1410_v6 = vld [vmem:[#allocation2 + $0x70] sm:$0xf0]  ;;  %v1793_v8 = vld [vmem:[#allocation2 + $0x164] sm:$0xf] }
  0x1d   :  { %707 = vmatpush.bf16.msrb.mxu1 %v1589_v42  ;;  %v1537_v4 = vor.u32 %v1795_v3, %v1536_v2  ;;  %v1413_v7 = vor.u32 %v1761_v5, %v1410_v6  ;;  %v1538_v9 = vld [vmem:[#allocation2 + $0x170] sm:$0xf0]  ;;  %v1392_v11 = vld [vmem:[#allocation2 + $0x40] sm:$0xf]  ;;  %v1759_v12 = vld [vmem:[#allocation2 + $0x4c] sm:$0xf0] }
  0x1e   :  { %v1541_v10 = vor.u32 %v1793_v8, %v1538_v9  ;;  %v1393_v13 = vor.u32 %v1759_v12, %v1392_v11  ;;  %v1520_v14 = vld [vmem:[#allocation2 + $0x140] sm:$0xf]  ;;  %v1791_v15 = vld [vmem:[#allocation2 + $0x14c] sm:$0xf0]  ;;  %v1757_v17 = vld [vmem:[#allocation2 + $0x44] sm:$0xf] }
  0x1f   :  { %636 = vmatpush.bf16.msrb.mxu2 %v1441_v44  ;;  %v1521_v16 = vor.u32 %v1791_v15, %v1520_v14  ;;  %v1394_v18 = vld [vmem:[#allocation2 + $0x50] sm:$0xf0]  ;;  %v1789_v19 = vld [vmem:[#allocation2 + $0x144] sm:$0xf]  ;;  %v1376_v23 = vld [vmem:[#allocation2 + $0x20] sm:$0xf] }
  0x20   :  { %660 = vmatpush.bf16.msrb.mxu3 %v1569_v45  ;;  %684 = vmatpush.bf16.msrb.mxu0 %v1445_v48  ;;  %v1397_v20 = vor.u32 %v1757_v17, %v1394_v18  ;;  %v1522_v21 = vld [vmem:[#allocation2 + $0x150] sm:$0xf0]  ;;  %v1755_v24 = vld [vmem:[#allocation2 + $0x2c] sm:$0xf0]  ;;  %v1504_v25 = vld [vmem:[#allocation2 + $0x120] sm:$0xf] }
  0x21   :  { %708 = vmatpush.bf16.msrb.mxu1 %v1573_v49  ;;  %v1525_v22 = vor.u32 %v1789_v19, %v1522_v21  ;;  %v1377_v26 = vor.u32 %v1755_v24, %v1376_v23  ;;  %v1787_v27 = vld [vmem:[#allocation2 + $0x12c] sm:$0xf0]  ;;  %v1753_v28 = vld [vmem:[#allocation2 + $0x24] sm:$0xf]  ;;  %v1378_v29 = vld [vmem:[#allocation2 + $0x30] sm:$0xf0] }
  0x22   :  { %v1505_v30 = vor.u32 %v1787_v27, %v1504_v25  ;;  %v1381_v31 = vor.u32 %v1753_v28, %v1378_v29  ;;  %v1785_v32 = vld [vmem:[#allocation2 + $0x124] sm:$0xf]  ;;  %v1506_v33 = vld [vmem:[#allocation2 + $0x130] sm:$0xf0]  ;;  %v1360_v35 = vld [vmem:[#allocation2] sm:$0xf] }
  0x23   :  { %637 = vmatpush.bf16.msrb.mxu2 %v1425_v54  ;;  %v1509_v34 = vor.u32 %v1785_v32, %v1506_v33  ;;  %v1751_v36 = vld [vmem:[#allocation2 + $0xc] sm:$0xf0]  ;;  %v1488_v37 = vld [vmem:[#allocation2 + $0x100] sm:$0xf]  ;;  %v1749_v40 = vld [vmem:[#allocation2 + $0x4] sm:$0xf] }
  0x24   :  { %661 = vmatpush.bf16.msrb.mxu3 %v1553_v58  ;;  %685 = vmatpush.bf16.msrb.mxu0 %v1429_v59  ;;  %v1361_v38 = vor.u32 %v1751_v36, %v1360_v35  ;;  %v1783_v39 = vld [vmem:[#allocation2 + $0x10c] sm:$0xf0]  ;;  %v1362_v41 = vld [vmem:[#allocation2 + $0x10] sm:$0xf0]  ;;  %v1781_v44 = vld [vmem:[#allocation2 + $0x104] sm:$0xf] }
  0x25   :  { %709 = vmatpush.bf16.msrb.mxu1 %v1557_v62  ;;  %v1489_v42 = vor.u32 %v1783_v39, %v1488_v37  ;;  %v1365_v43 = vor.u32 %v1749_v40, %v1362_v41  ;;  %v1490_v45 = vld [vmem:[#allocation2 + $0x110] sm:$0xf0]  ;;  %v1480_v47 = vld [vmem:[#allocation2 + $0xe8] sm:$0xf]  ;;  %v1780_v48 = vld [vmem:[#allocation2 + $0xf4] sm:$0xf0] }
  0x26   :  { %1353 = vmatmul.msk.bf16.gmra.mxu0 %vm128_vm0, %v1743_v50  ;;  %v1493_v46 = vor.u32 %v1781_v44, %v1490_v45  ;;  %v1608_v49 = vld [vmem:[#allocation2 + $0x1e8] sm:$0xf]  ;;  %v1812_v51 = vld [vmem:[#allocation2 + $0x1f4] sm:$0xf0]  ;;  %v87_v52 = vld [vmem:[%s2264_s2] sm:$0x3] }
  0x27   :  { %1356 = vmatmul.msk.bf16.gmra.mxu1 %vm128_vm0, %v1743_v50  ;;  %638 = vmatpush.bf16.msrb.mxu2 %v1409_v1  ;;  %v1481_v50 = vor.u32 %v1780_v48, %v1480_v47  ;;  %v1609_v53 = vor.u32 %v1812_v51, %v1608_v49  ;;  %v2034_v54 = vperm.slane %v87_v52, 0  ;;  %v2036_v55 = vperm.slane %v87_v52, 1  ;;  %v198_v57 = vld [vmem:[%s2265_s3] sm:$0x3]  ;;  %v1464_v61 = vld [vmem:[#allocation2 + $0xc8] sm:$0xf] }
  0x28   :  { %662 = vmatpush.bf16.msrb.mxu3 %v1537_v4  ;;  %686 = vmatpush.bf16.msrb.mxu0 %v1413_v7  ;;  %v1776_v62 = vld [vmem:[#allocation2 + $0xd4] sm:$0xf0]  ;;  %v1592_v63 = vld [vmem:[#allocation2 + $0x1c8] sm:$0xf]  ;;  %v2043_v0 = vperm.slane %v198_v57, 0  ;;  %v2045_v1 = vperm.slane %v198_v57, 1 }
  0x29   :  { %710 = vmatpush.bf16.msrb.mxu1 %v1541_v10  ;;  %v1465_v2 = vor.u32 %v1776_v62, %v1464_v61  ;;  %v1808_v3 = vld [vmem:[#allocation2 + $0x1d4] sm:$0xf0]  ;;  %v1778_v4 = vld [vmem:[#allocation2 + $0xec] sm:$0xf]  ;;  %v1482_v8 = vld [vmem:[#allocation2 + $0xf8] sm:$0xf0] }
  0x2a   :  { %v1593_v7 = vor.u32 %v1808_v3, %v1592_v63  ;;  %v1810_v9 = vld [vmem:[#allocation2 + $0x1ec] sm:$0xf]  ;;  %v1485_v10 = vor.u32 %v1778_v4, %v1482_v8  ;;  %v1610_v11 = vld [vmem:[#allocation2 + $0x1f8] sm:$0xf0]  ;;  %v1448_v12 = vld [vmem:[#allocation2 + $0xa8] sm:$0xf] }
  0x2b   :  { %639 = vmatpush.bf16.msrb.mxu2 %v1393_v13  ;;  %v1772_v13 = vld [vmem:[#allocation2 + $0xb4] sm:$0xf0]  ;;  %v216_v14 = vld [vmem:[%s2266_s4] sm:$0x3]  ;;  %v1613_v15 = vor.u32 %v1810_v9, %v1610_v11  ;;  %v1576_v17 = vld [vmem:[#allocation2 + $0x1a8] sm:$0xf] }
  0x2c   :  { %663 = vmatpush.bf16.msrb.mxu3 %v1521_v16  ;;  %687 = vmatpush.bf16.msrb.mxu0 %v1397_v20  ;;  %v1449_v16 = vor.u32 %v1772_v13, %v1448_v12  ;;  %v1804_v18 = vld [vmem:[#allocation2 + $0x1b4] sm:$0xf0]  ;;  %v1774_v19 = vld [vmem:[#allocation2 + $0xcc] sm:$0xf]  ;;  %v1466_v21 = vld [vmem:[#allocation2 + $0xd8] sm:$0xf0] }
  0x2d   :  { %711 = vmatpush.bf16.msrb.mxu1 %v1525_v22  ;;  %v1577_v20 = vor.u32 %v1804_v18, %v1576_v17  ;;  %v1806_v22 = vld [vmem:[#allocation2 + $0x1cc] sm:$0xf]  ;;  %v1594_v23 = vld [vmem:[#allocation2 + $0x1d8] sm:$0xf0]  ;;  %v1469_v25 = vor.u32 %v1774_v19, %v1466_v21  ;;  %v1432_v27 = vld [vmem:[#allocation2 + $0x88] sm:$0xf] }
  0x2e   :  { %v1768_v28 = vld [vmem:[#allocation2 + $0x94] sm:$0xf0]  ;;  %v1560_v29 = vld [vmem:[#allocation2 + $0x188] sm:$0xf]  ;;  %v1450_v37 = vld [vmem:[#allocation2 + $0xb8] sm:$0xf0] }
  0x2f   :  { %640 = vmatpush.bf16.msrb.mxu2 %v1377_v26  ;;  %v1597_v26 = vor.u32 %v1806_v22, %v1594_v23  ;;  %v1433_v32 = vor.u32 %v1768_v28, %v1432_v27  ;;  %v1800_v33 = vld [vmem:[#allocation2 + $0x194] sm:$0xf0]  ;;  %v2053_v40 = vperm.slane %v216_v14, 0  ;;  %v1416_v44 = vld [vmem:[#allocation2 + $0x68] sm:$0xf] }
  0x30   :  { %664 = vmatpush.bf16.msrb.mxu3 %v1505_v30  ;;  %688 = vmatpush.bf16.msrb.mxu0 %v1381_v31  ;;  %v1561_v36 = vor.u32 %v1800_v33, %v1560_v29  ;;  %v1764_v49 = vld [vmem:[#allocation2 + $0x74] sm:$0xf0]  ;;  %v1562_v61 = vld [vmem:[#allocation2 + $0x198] sm:$0xf0]  ;;  %v1762_v13 = vld [vmem:[#allocation2 + $0x6c] sm:$0xf] }
  0x31   :  { %712 = vmatpush.bf16.msrb.mxu1 %v1509_v34  ;;  %v1770_v34 = vld [vmem:[#allocation2 + $0xac] sm:$0xf]  ;;  %v1417_v52 = vor.u32 %v1764_v49, %v1416_v44  ;;  %v1760_v3 = vld [vmem:[#allocation2 + $0x54] sm:$0xf0]  ;;  %v1546_v18 = vld [vmem:[#allocation2 + $0x178] sm:$0xf0] }
  0x32   :  { %v1794_v17 = vld [vmem:[#allocation2 + $0x16c] sm:$0xf]  ;;  %v1792_v21 = vld [vmem:[#allocation2 + $0x154] sm:$0xf0]  ;;  %v1496_v49 = vld [vmem:[#allocation2 + $0x108] sm:$0xf] }
  0x33   :  { %641 = vmatpush.bf16.msrb.mxu2 %v1361_v38  ;;  %v1802_v38 = vld [vmem:[#allocation2 + $0x1ac] sm:$0xf]  ;;  %v1756_v27 = vld [vmem:[#allocation2 + $0x34] sm:$0xf0] }
  0x34   :  { %665 = vmatpush.bf16.msrb.mxu3 %v1489_v42  ;;  %689 = vmatpush.bf16.msrb.mxu0 %v1365_v43  ;;  %v1453_v42 = vor.u32 %v1770_v34, %v1450_v37  ;;  %v1578_v43 = vld [vmem:[#allocation2 + $0x1b8] sm:$0xf0]  ;;  %v1758_v28 = vld [vmem:[#allocation2 + $0x4c] sm:$0xf]  ;;  %v1512_v34 = vld [vmem:[#allocation2 + $0x128] sm:$0xf] }
  0x35   :  { %713 = vmatpush.bf16.msrb.mxu1 %v1493_v46  ;;  %v2056_v46 = vperm.slane %v216_v14, 1  ;;  %v1581_v48 = vor.u32 %v1802_v38, %v1578_v43  ;;  %v1418_v14 = vld [vmem:[#allocation2 + $0x78] sm:$0xf0] }
  0x37   :  { %730 = vmatpush.bf16.msra.mxu2 %v1481_v50  ;;  %v1544_v50 = vld [vmem:[#allocation2 + $0x168] sm:$0xf] }
  0x38   :  { %754 = vmatpush.bf16.msra.mxu3 %v1609_v53  ;;  %778 = vmatpush.bf16.msra.mxu0 %v1485_v10  ;;  %v1796_v53 = vld [vmem:[#allocation2 + $0x174] sm:$0xf0] }
  0x39   :  { %802 = vmatpush.bf16.msra.mxu1 %v1613_v15 }
  0x3b   :  { %731 = vmatpush.bf16.msra.mxu2 %v1465_v2  ;;  %v1400_v2 = vld [vmem:[#allocation2 + $0x48] sm:$0xf] }
  0x3c   :  { %755 = vmatpush.bf16.msra.mxu3 %v1593_v7  ;;  %779 = vmatpush.bf16.msra.mxu0 %v1469_v25  ;;  %v1401_v12 = vor.u32 %v1760_v3, %v1400_v2  ;;  %v1549_v25 = vor.u32 %v1794_v17, %v1546_v18 }
  0x3d   :  { %803 = vmatpush.bf16.msra.mxu1 %v1597_v26  ;;  %v1384_v26 = vld [vmem:[#allocation2 + $0x28] sm:$0xf] }
  0x3e   :  { %v1385_v29 = vor.u32 %v1756_v27, %v1384_v26 }
  0x3f   :  { %732 = vmatpush.bf16.msra.mxu2 %v1449_v16 }
  0x40   :  { %756 = vmatpush.bf16.msra.mxu3 %v1577_v20  ;;  %780 = vmatpush.bf16.msra.mxu0 %v1453_v42  ;;  %v1528_v20 = vld [vmem:[#allocation2 + $0x148] sm:$0xf] }
  0x41   :  { %804 = vmatpush.bf16.msra.mxu1 %v1581_v48  ;;  %v1529_v23 = vor.u32 %v1792_v21, %v1528_v20  ;;  %v1752_v48 = vld [vmem:[#allocation2 + $0x14] sm:$0xf0] }
  0x43   :  { %733 = vmatpush.bf16.msra.mxu2 %v1433_v32  ;;  %v1530_v32 = vld [vmem:[#allocation2 + $0x158] sm:$0xf0] }
  0x44   :  { %757 = vmatpush.bf16.msra.mxu3 %v1561_v36 }
  0x47   :  { %734 = vmatpush.bf16.msra.mxu2 %v1417_v52  ;;  %v1514_v52 = vld [vmem:[#allocation2 + $0x138] sm:$0xf0] }
  0x4b   :  { %735 = vmatpush.bf16.msra.mxu2 %v1401_v12 }
  0x4f   :  { %736 = vmatpush.bf16.msra.mxu2 %v1385_v29 }
  0x93   :  { %v147_v56 = vpop.f32.mrf.mxu0 }
  0x94   :  { %v148_v58 = vadd.f32 %v147_v56, %v2034_v54  ;;  %v171_v59 = vpop.f32.mrf.mxu1  ;;  %v1766_v56 = vld [vmem:[#allocation2 + $0x8c] sm:$0xf] }
  0x95   :  { %v172_v60 = vadd.f32 %v171_v59, %v2036_v55  ;;  %v1434_v59 = vld [vmem:[#allocation2 + $0x98] sm:$0xf0] }
  0x96   :  { %v186_v5 = vmax.f32 %v148_v58, 0.0  ;;  %v1545_v58 = vor.u32 %v1796_v53, %v1544_v50  ;;  %v1437_v9 = vor.u32 %v1766_v56, %v1434_v59  ;;  %v1784_v56 = vld [vmem:[#allocation2 + $0x114] sm:$0xf0] }
  0x97   :  { %v187_v6 = vmax.f32 %v172_v60, 0.0  ;;  %v1798_v60 = vld [vmem:[#allocation2 + $0x18c] sm:$0xf]  ;;  %v1497_v59 = vor.u32 %v1784_v56, %v1496_v49 }
  0x98   :  { %v204_v39 = vmul.f32 %v2043_v0, %v186_v5  ;;  %v1565_v10 = vor.u32 %v1798_v60, %v1562_v61  ;;  %758 = vmatpush.bf16.msra.mxu3 %v1545_v58  ;;  %781 = vmatpush.bf16.msra.mxu0 %v1437_v9  ;;  %v1498_v9 = vld [vmem:[#allocation2 + $0x118] sm:$0xf0] }
  0x99   :  { %v205_v45 = vmul.f32 %v2045_v1, %v187_v6  ;;  %v2071_v16 = vpop.f32.mrf.mxu2 }
  0x9a   :  { %v222_v62 = vadd.f32 %v2053_v40, %v204_v39  ;;  %805 = vmatpush.bf16.msra.mxu1 %v1565_v10  ;;  %v1754_v39 = vld [vmem:[#allocation2 + $0x2c] sm:$0xf] }
  0x9b   :  { %v149_v24 = vpop.f32.mrf.mxu0  ;;  %v223_v4 = vadd.f32 %v2056_v46, %v205_v45 }
  0x9c   :  { %v150_v30 = vadd.f32 %v149_v24, %v2034_v54  ;;  %v173_v31 = vpop.f32.mrf.mxu1  ;;  %v2076_v22 = vpop.f32.mrf.mxu3  ;;  %v1421_v24 = vor.u32 %v1762_v13, %v1418_v14  ;;  %759 = vmatpush.bf16.msra.mxu3 %v1529_v23 }
  0x9d   :  { %v174_v35 = vadd.f32 %v173_v31, %v2036_v55  ;;  %v1790_v31 = vld [vmem:[#allocation2 + $0x14c] sm:$0xf] }
  0x9e   :  { %v188_v41 = vmax.f32 %v150_v30, 0.0  ;;  %v1402_v30 = vld [vmem:[#allocation2 + $0x58] sm:$0xf0]  ;;  %782 = vmatpush.bf16.msra.mxu0 %v1421_v24  ;;  %806 = vmatpush.bf16.msra.mxu1 %v1549_v25  ;;  %v1533_v45 = vor.u32 %v1790_v31, %v1530_v32  ;;  %v182_v24 = vadd.f32 %v2076_v22, %v2036_v55 }
  0x9f   :  { %v189_v47 = vmax.f32 %v174_v35, 0.0  ;;  %v1788_v35 = vld [vmem:[#allocation2 + $0x134] sm:$0xf0]  ;;  %v1405_v44 = vor.u32 %v1758_v28, %v1402_v30 }
  0xa0   :  { %v206_v51 = vmul.f32 %v2043_v0, %v188_v41  ;;  %v1513_v38 = vor.u32 %v1788_v35, %v1512_v34  ;;  %v1386_v41 = vld [vmem:[#allocation2 + $0x38] sm:$0xf0] }
  0xa1   :  { %v207_v57 = vmul.f32 %v2045_v1, %v189_v47  ;;  %v1368_v47 = vld [vmem:[#allocation2 + $0x8] sm:$0xf]  ;;  %v1389_v2 = vor.u32 %v1754_v39, %v1386_v41  ;;  %v1823_v39 = vld [vmem:[#allocation4 + $0x50] sm:$0xff]  ;;  %v1816_v41 = vld [vmem:[#allocation4 + $0x18] sm:$0xff] }
  0xa2   :  { %v224_v63 = vadd.f32 %v2053_v40, %v206_v51  ;;  %v1786_v51 = vld [vmem:[#allocation2 + $0x12c] sm:$0xf]  ;;  %v1369_v53 = vor.u32 %v1752_v48, %v1368_v47  ;;  %760 = vmatpush.bf16.msra.mxu3 %v1513_v38  ;;  %783 = vmatpush.bf16.msra.mxu0 %v1405_v44  ;;  %v1817_v38 = vld [vmem:[#allocation4 + $0x20] sm:$0xff] }
  0xa3   :  { %v225_v5 = vadd.f32 %v2056_v46, %v207_v57  ;;  %v152_v6 = vpop.f32.mrf.mxu0  ;;  %807 = vmatpush.bf16.msra.mxu1 %v1533_v45  ;;  %v1517_v3 = vor.u32 %v1786_v51, %v1514_v52  ;;  %v1821_v44 = vld [vmem:[#allocation4 + $0x40] sm:$0xff]  ;;  %v1814_v45 = vld [vmem:[#allocation4 + $0x8] sm:$0xff]  ;;  %v1844_v51 = vld [vmem:[#allocation4 + $0xf8] sm:$0xff] }
  0xa4   :  { %v2064_v7 = vpack.c.bf16 %v224_v63, %v222_v62  ;;  %v176_v8 = vpop.f32.mrf.mxu1  ;;  %v153_v15 = vadd.f32 %v152_v6, %v2034_v54  ;;  %v159_v63 = vpop.f32.mrf.mxu2  ;;  %737 = vmatpush.bf16.msra.mxu2 %v1369_v53  ;;  %v1370_v6 = vld [vmem:[#allocation2 + $0x18] sm:$0xf0]  ;;  %v1813_v47 = vld [vmem:[#allocation4] sm:$0xff] }
  0xa5   :  { %v2066_v11 = vpack.c.bf16 %v225_v5, %v223_v4  ;;  %v177_v19 = vadd.f32 %v176_v8, %v2036_v55  ;;  %v1750_v4 = vld [vmem:[#allocation2 + $0xc] sm:$0xf]  ;;  %v183_v13 = vpop.f32.mrf.mxu3  ;;  %v160_v18 = vadd.f32 %v159_v63, %v2034_v54  ;;  %v2109_v48 = vld [vmem:[%s2268_s6] sm:$0xf]  ;;  %v1835_v63 = vld [vmem:[#allocation4 + $0xb0] sm:$0xff] }
  0xa6   :  { %642 = vmatmul.bf16.vlgmr.msrb.gmra.mxu2 %v2064_v7  ;;  %690 = vmatmul.bf16.vlgmr.msrb.gmra.mxu0 %v2064_v7  ;;  %v190_v33 = vmax.f32 %v153_v15, 0.0  ;;  %v1782_v8 = vld [vmem:[#allocation2 + $0x10c] sm:$0xf]  ;;  %v158_v15 = vadd.f32 %v2071_v16, %v2034_v54  ;;  %v1373_v20 = vor.u32 %v1750_v4, %v1370_v6  ;;  %v184_v25 = vadd.f32 %v183_v13, %v2036_v55 }
  0xa7   :  { %666 = vmatmul.bf16.vlgmr.msrb.gmra.mxu3 %v2066_v11  ;;  %714 = vmatmul.bf16.vlgmr.msrb.gmra.mxu1 %v2066_v11  ;;  %v191_v36 = vmax.f32 %v177_v19, 0.0  ;;  %v1501_v21 = vor.u32 %v1782_v8, %v1498_v9  ;;  %v196_v26 = vmax.f32 %v160_v18, 0.0  ;;  %v2112_v49 = vperm.slane %v2109_v48, 1  ;;  %v2131_v9 = vld [vmem:[%s2270_s8] sm:$0xf]  ;;  %v1842_v18 = vld [vmem:[#allocation4 + $0xe8] sm:$0xff] }
  0xa8   :  { %v208_v57 = vmul.f32 %v2043_v0, %v190_v33  ;;  %761 = vmatpush.bf16.msra.mxu3 %v1497_v59  ;;  %784 = vmatpush.bf16.msra.mxu0 %v1389_v2  ;;  %v194_v16 = vmax.f32 %v158_v15, 0.0  ;;  %v197_v27 = vmax.f32 %v184_v25, 0.0  ;;  %v2121_v59 = vld [vmem:[%s2269_s7] sm:$0xf]  ;;  %v1843_v2 = vld [vmem:[#allocation4 + $0xf0] sm:$0xff] }
  0xa9   :  { %v209_v60 = vmul.f32 %v2045_v1, %v191_v36  ;;  %808 = vmatpush.bf16.msra.mxu1 %v1517_v3  ;;  %v214_v29 = vmul.f32 %v2043_v0, %v196_v26  ;;  %v1825_v36 = vld [vmem:[#allocation4 + $0x60] sm:$0xff] }
  0xaa   :  { %v226_v10 = vadd.f32 %v2053_v40, %v208_v57  ;;  %v212_v28 = vmul.f32 %v2043_v0, %v194_v16  ;;  %v215_v22 = vmul.f32 %v2045_v1, %v197_v27  ;;  %v2116_v57 = vperm.slane %v2109_v48, 0  ;;  %v1833_v16 = vld [vmem:[#allocation4 + $0xa0] sm:$0xff] }
  0xab   :  { %v154_v37 = vpop.f32.mrf.mxu0  ;;  %v227_v14 = vadd.f32 %v2056_v46, %v209_v60  ;;  %v232_v31 = vadd.f32 %v2053_v40, %v214_v29 }
  0xac   :  { %v155_v42 = vadd.f32 %v154_v37, %v2034_v54  ;;  %v178_v43 = vpop.f32.mrf.mxu1  ;;  %785 = vmatpush.bf16.msra.mxu0 %v1373_v20  ;;  %v195_v54 = vmax.f32 %v182_v24, 0.0  ;;  %v233_v33 = vadd.f32 %v2056_v46, %v215_v22  ;;  %v1824_v37 = vld [vmem:[#allocation4 + $0x58] sm:$0xff]  ;;  %v1841_v22 = vld [vmem:[#allocation4 + $0xe0] sm:$0xff] }
  0xad   :  { %v179_v50 = vadd.f32 %v178_v43, %v2036_v55  ;;  %809 = vmatpush.bf16.msra.mxu1 %v1501_v21  ;;  %v230_v55 = vadd.f32 %v2053_v40, %v212_v28  ;;  %v1815_v43 = vld [vmem:[#allocation4 + $0x10] sm:$0xff]  ;;  %v2138_v21 = vperm.slane %v2121_v59, 0 }
  0xae   :  { %v192_v58 = vmax.f32 %v155_v42, 0.0  ;;  %v213_v30 = vmul.f32 %v2045_v1, %v195_v54  ;;  %v1822_v42 = vld [vmem:[#allocation4 + $0x48] sm:$0xff] }
  0xaf   :  { %v193_v61 = vmax.f32 %v179_v50, 0.0  ;;  %v238_v34 = vpack.c.bf16 %v232_v31, %v230_v55  ;;  %v1836_v50 = vld [vmem:[#allocation4 + $0xb8] sm:$0xff]  ;;  %v2147_v31 = vperm.slane %v2131_v9, 0 }
  0xb0   :  { %v210_v62 = vmul.f32 %v2043_v0, %v192_v58  ;;  %v231_v32 = vadd.f32 %v2056_v46, %v213_v30  ;;  %v1828_v0 = vld [vmem:[#allocation4 + $0x78] sm:$0xff]  ;;  %1238 = vmatpush.bf16.msrb.mxu0 %v1836_v50 }
  0xb1   :  { %v211_v5 = vmul.f32 %v2045_v1, %v193_v61  ;;  %v1820_v1 = vld [vmem:[#allocation4 + $0x38] sm:$0xff]  ;;  %1214 = vmatpush.bf16.msrb.mxu3 %v1828_v0  ;;  %1262 = vmatpush.bf16.msrb.mxu1 %v1844_v51  ;;  %v1838_v51 = vld [vmem:[#allocation4 + $0xc8] sm:$0xff] }
  0xb2   :  { %v228_v12 = vadd.f32 %v2053_v40, %v210_v62  ;;  %v239_v35 = vpack.c.bf16 %v233_v33, %v231_v32  ;;  %v1827_v40 = vld [vmem:[#allocation4 + $0x70] sm:$0xff]  ;;  %1190 = vmatpush.bf16.msrb.mxu2 %v1820_v1  ;;  %v1840_v0 = vld [vmem:[#allocation4 + $0xd8] sm:$0xff] }
  0xb3   :  { %v229_v17 = vadd.f32 %v2056_v46, %v211_v5  ;;  %v1826_v46 = vld [vmem:[#allocation4 + $0x68] sm:$0xff]  ;;  %v2125_v5 = vperm.slane %v2121_v59, 1 }
  0xb4   :  { %v236_v19 = vpack.c.bf16 %v228_v12, %v226_v10  ;;  %1239 = vmatpush.bf16.msrb.mxu0 %v1835_v63 }
  0xb5   :  { %v237_v23 = vpack.c.bf16 %v229_v17, %v227_v14  ;;  %1215 = vmatpush.bf16.msrb.mxu3 %v1827_v40  ;;  %1263 = vmatpush.bf16.msrb.mxu1 %v1843_v2  ;;  %v2135_v14 = vperm.slane %v2131_v9, 1  ;;  %v1834_v17 = vld [vmem:[#allocation4 + $0xa8] sm:$0xff] }
  0xb6   :  { %647 = vmatmul.bf16.gmra.mxu2 %v236_v19  ;;  %695 = vmatmul.bf16.gmra.mxu0 %v236_v19 }
  0xb7   :  { %671 = vmatmul.bf16.gmra.mxu3 %v237_v23  ;;  %719 = vmatmul.bf16.gmra.mxu1 %v237_v23 }
  0xb8   :  { %1240 = vmatpush.bf16.msrb.mxu0 %v1834_v17 }
  0xb9   :  { %1216 = vmatpush.bf16.msrb.mxu3 %v1826_v46  ;;  %1264 = vmatpush.bf16.msrb.mxu1 %v1842_v18 }
  0xbc   :  { %1241 = vmatpush.bf16.msrb.mxu0 %v1833_v16  ;;  %v1829_v16 = vld [vmem:[#allocation4 + $0x80] sm:$0xff] }
  0xbd   :  { %1217 = vmatpush.bf16.msrb.mxu3 %v1825_v36  ;;  %1265 = vmatpush.bf16.msrb.mxu1 %v1841_v22 }
  0xc1   :  { %1218 = vmatpush.bf16.msrb.mxu3 %v1824_v37  ;;  %1266 = vmatpush.bf16.msrb.mxu1 %v1840_v0 }
  0xc5   :  { %1219 = vmatpush.bf16.msrb.mxu3 %v1823_v39 }
  0xc6   :  { %652 = vmatmul.bf16.gmra.mxu2 %v238_v34  ;;  %700 = vmatmul.bf16.gmra.mxu0 %v238_v34 }
  0xc7   :  { %676 = vmatmul.bf16.gmra.mxu3 %v239_v35  ;;  %724 = vmatmul.bf16.gmra.mxu1 %v239_v35 }
  0xc9   :  { %1220 = vmatpush.bf16.msrb.mxu3 %v1822_v42  ;;  %v1832_v42 = vld [vmem:[#allocation4 + $0x98] sm:$0xff] }
  0xca   :  { %1242 = vmatpush.bf16.msrb.mxu0 %v1832_v42  ;;  %v2177_v42 = vperm.slane %v2109_v48, 2 }
  0xcd   :  { %1221 = vmatpush.bf16.msrb.mxu3 %v1821_v44 }
  0xd6   :  { %738 = vmatmul.bf16.vlgmr.msra.gmra.mxu2 %v2064_v7  ;;  %786 = vmatmul.bf16.vlgmr.msra.gmra.mxu0 %v2064_v7  ;;  %v1819_v7 = vld [vmem:[#allocation4 + $0x30] sm:$0xff] }
  0xd7   :  { %762 = vmatmul.bf16.vlgmr.msra.gmra.mxu3 %v2066_v11  ;;  %810 = vmatmul.bf16.vlgmr.msra.gmra.mxu1 %v2066_v11  ;;  %v1818_v11 = vld [vmem:[#allocation4 + $0x28] sm:$0xff] }
  0xd8   :  { %1191 = vmatpush.bf16.msrb.mxu2 %v1819_v7 }
  0xdc   :  { %1192 = vmatpush.bf16.msrb.mxu2 %v1818_v11 }
  0xe0   :  { %1193 = vmatpush.bf16.msrb.mxu2 %v1817_v38 }
  0xe4   :  { %1194 = vmatpush.bf16.msrb.mxu2 %v1816_v41 }
  0xe6   :  { %743 = vmatmul.bf16.gmra.mxu2 %v236_v19  ;;  %791 = vmatmul.bf16.gmra.mxu0 %v236_v19 }
  0xe7   :  { %767 = vmatmul.bf16.gmra.mxu3 %v237_v23  ;;  %815 = vmatmul.bf16.gmra.mxu1 %v237_v23 }
  0xe8   :  { %1195 = vmatpush.bf16.msrb.mxu2 %v1815_v43  ;;  %v1839_v43 = vld [vmem:[#allocation4 + $0xd0] sm:$0xff] }
  0xe9   :  { %1267 = vmatpush.bf16.msrb.mxu1 %v1839_v43 }
  0xec   :  { %1196 = vmatpush.bf16.msrb.mxu2 %v1814_v45 }
  0xed   :  { %1268 = vmatpush.bf16.msrb.mxu1 %v1838_v51 }
  0xf0   :  { %1197 = vmatpush.bf16.msrb.mxu2 %v1813_v47 }
  0xf6   :  { %748 = vmatmul.bf16.gmra.mxu2 %v238_v34  ;;  %796 = vmatmul.bf16.gmra.mxu0 %v238_v34 }
  0xf7   :  { %772 = vmatmul.bf16.gmra.mxu3 %v239_v35  ;;  %820 = vmatmul.bf16.gmra.mxu1 %v239_v35 }
 0x123   :  { %v691_v52 = vpop.f32.mrf.mxu0 }
 0x124   :  { %v692_v53 = vadd.f32 %v691_v52, %v2112_v49  ;;  %v715_v56 = vpop.f32.mrf.mxu1 }
 0x126   :  { %v716_v58 = vadd.f32 %v715_v56, %v692_v53 }
 0x128   :  { %v827_v4 = vmax.f32 %v716_v58, 0.0 }
 0x129   :  { %v643_v60 = vpop.f32.mrf.mxu2 }
 0x12a   :  { %v644_v61 = vadd.f32 %v643_v60, %v2116_v57  ;;  %v667_v62 = vpop.f32.mrf.mxu3  ;;  %v861_v13 = vmul.f32 %v2125_v5, %v827_v4 }
 0x12b   :  { %v693_v3 = vpop.f32.mrf.mxu0 }
 0x12c   :  { %v694_v6 = vadd.f32 %v693_v3, %v2112_v49  ;;  %v717_v8 = vpop.f32.mrf.mxu1  ;;  %v668_v10 = vadd.f32 %v667_v62, %v644_v61  ;;  %v895_v54 = vadd.f32 %v2135_v14, %v861_v13  ;;  %v1831_v61 = vld [vmem:[#allocation4 + $0x90] sm:$0xff] }
 0x12d   :  { %1243 = vmatpush.bf16.msrb.mxu0 %v1831_v61  ;;  %v2189_v61 = vperm.slane %v2131_v9, 3 }
 0x12e   :  { %v718_v12 = vadd.f32 %v717_v8, %v694_v6  ;;  %v826_v20 = vmax.f32 %v668_v10, 0.0  ;;  %v1837_v8 = vld [vmem:[#allocation4 + $0xc0] sm:$0xff] }
 0x12f   :  { %1269 = vmatpush.bf16.msrb.mxu1 %v1837_v8 }
 0x130   :  { %v831_v15 = vmax.f32 %v718_v12, 0.0  ;;  %v860_v55 = vmul.f32 %v2138_v21, %v826_v20 }
 0x131   :  { %v645_v19 = vpop.f32.mrf.mxu2 }
 0x132   :  { %v865_v23 = vmul.f32 %v2125_v5, %v831_v15  ;;  %v646_v24 = vadd.f32 %v645_v19, %v2116_v57  ;;  %v669_v25 = vpop.f32.mrf.mxu3  ;;  %v894_v40 = vadd.f32 %v2147_v31, %v860_v55  ;;  %v1830_v15 = vld [vmem:[#allocation4 + $0x88] sm:$0xff] }
 0x133   :  { %v696_v26 = vpop.f32.mrf.mxu0  ;;  %1244 = vmatpush.bf16.msrb.mxu0 %v1830_v15 }
 0x134   :  { %v899_v27 = vadd.f32 %v2135_v14, %v865_v23  ;;  %v670_v28 = vadd.f32 %v669_v25, %v646_v24  ;;  %v697_v29 = vadd.f32 %v696_v26, %v2112_v49  ;;  %v720_v30 = vpop.f32.mrf.mxu1 }
 0x136   :  { %v919_v32 = vpack.c.bf16 %v899_v27, %v895_v54  ;;  %v830_v33 = vmax.f32 %v670_v28, 0.0  ;;  %v721_v35 = vadd.f32 %v720_v30, %v697_v29 }
 0x137   :  { %1245 = vmatpush.bf16.msrb.mxu0 %v1829_v16 }
 0x138   :  { %v864_v34 = vmul.f32 %v2138_v21, %v830_v33  ;;  %1222 = vmatmul.bf16.vlgmr.msrb.gmra.mxu3 %v919_v32  ;;  %v835_v38 = vmax.f32 %v721_v35, 0.0  ;;  %v2168_v33 = vperm.slane %v2109_v48, 3 }
 0x139   :  { %v648_v1 = vpop.f32.mrf.mxu2 }
 0x13a   :  { %v898_v46 = vadd.f32 %v2147_v31, %v864_v34  ;;  %v649_v7 = vadd.f32 %v648_v1, %v2116_v57  ;;  %v672_v36 = vpop.f32.mrf.mxu3  ;;  %v869_v47 = vmul.f32 %v2125_v5, %v835_v38 }
 0x13b   :  { %v698_v11 = vpop.f32.mrf.mxu0 }
 0x13c   :  { %v918_v37 = vpack.c.bf16 %v898_v46, %v894_v40  ;;  %v699_v39 = vadd.f32 %v698_v11, %v2112_v49  ;;  %v722_v41 = vpop.f32.mrf.mxu1  ;;  %v673_v44 = vadd.f32 %v672_v36, %v649_v7  ;;  %v903_v4 = vadd.f32 %v2135_v14, %v869_v47 }
 0x13e   :  { %v723_v45 = vadd.f32 %v722_v41, %v699_v39  ;;  %1198 = vmatmul.bf16.vlgmr.msrb.gmra.mxu2 %v918_v37  ;;  %v834_v53 = vmax.f32 %v673_v44, 0.0 }
 0x140   :  { %v839_v50 = vmax.f32 %v723_v45, 0.0  ;;  %v868_v10 = vmul.f32 %v2138_v21, %v834_v53 }
 0x141   :  { %v650_v52 = vpop.f32.mrf.mxu2 }
 0x142   :  { %v873_v56 = vmul.f32 %v2125_v5, %v839_v50  ;;  %v651_v58 = vadd.f32 %v650_v52, %v2116_v57  ;;  %v674_v60 = vpop.f32.mrf.mxu3  ;;  %v902_v24 = vadd.f32 %v2147_v31, %v868_v10  ;;  %v2184_v52 = vperm.slane %v2121_v59, 3 }
 0x143   :  { %v701_v62 = vpop.f32.mrf.mxu0 }
 0x144   :  { %v675_v63 = vadd.f32 %v674_v60, %v651_v58  ;;  %v702_v2 = vadd.f32 %v701_v62, %v2112_v49  ;;  %v725_v3 = vpop.f32.mrf.mxu1  ;;  %v907_v6 = vadd.f32 %v2135_v14, %v873_v56 }
 0x146   :  { %v838_v12 = vmax.f32 %v675_v63, 0.0  ;;  %v923_v13 = vpack.c.bf16 %v907_v6, %v903_v4  ;;  %v726_v18 = vadd.f32 %v725_v3, %v702_v2  ;;  %v2192_v2 = vperm.slane %v2121_v59, 2 }
 0x148   :  { %v872_v17 = vmul.f32 %v2138_v21, %v838_v12  ;;  %1227 = vmatmul.bf16.gmra.mxu3 %v923_v13  ;;  %v843_v54 = vmax.f32 %v726_v18, 0.0 }
 0x149   :  { %v653_v19 = vpop.f32.mrf.mxu2 }
 0x14a   :  { %v654_v20 = vadd.f32 %v653_v19, %v2116_v57  ;;  %v677_v23 = vpop.f32.mrf.mxu3  ;;  %v906_v25 = vadd.f32 %v2147_v31, %v872_v17  ;;  %v877_v55 = vmul.f32 %v2125_v5, %v843_v54  ;;  %v2201_v19 = vperm.slane %v2131_v9, 2 }
 0x14b   :  { %v703_v26 = vpop.f32.mrf.mxu0 }
 0x14c   :  { %v704_v27 = vadd.f32 %v703_v26, %v2112_v49  ;;  %v727_v28 = vpop.f32.mrf.mxu1  ;;  %v922_v29 = vpack.c.bf16 %v906_v25, %v902_v24  ;;  %v678_v30 = vadd.f32 %v677_v23, %v654_v20  ;;  %v911_v11 = vadd.f32 %v2135_v14, %v877_v55 }
 0x14e   :  { %v728_v22 = vadd.f32 %v727_v28, %v704_v27  ;;  %1203 = vmatmul.bf16.gmra.mxu2 %v922_v29  ;;  %v842_v35 = vmax.f32 %v678_v30, 0.0 }
 0x150   :  { %v847_v32 = vmax.f32 %v728_v22, 0.0  ;;  %v876_v38 = vmul.f32 %v2138_v21, %v842_v35 }
 0x151   :  { %v655_v34 = vpop.f32.mrf.mxu2 }
 0x152   :  { %v881_v0 = vmul.f32 %v2125_v5, %v847_v32  ;;  %v656_v1 = vadd.f32 %v655_v34, %v2116_v57  ;;  %v679_v40 = vpop.f32.mrf.mxu3  ;;  %v910_v47 = vadd.f32 %v2147_v31, %v876_v38 }
 0x153   :  { %v787_v49 = vpop.f32.mrf.mxu0 }
 0x154   :  { %v680_v46 = vadd.f32 %v679_v40, %v656_v1  ;;  %v788_v7 = vadd.f32 %v787_v49, %v2168_v33  ;;  %v811_v36 = vpop.f32.mrf.mxu1  ;;  %v915_v37 = vadd.f32 %v2135_v14, %v881_v0 }
 0x156   :  { %v846_v39 = vmax.f32 %v680_v46, 0.0  ;;  %v927_v41 = vpack.c.bf16 %v915_v37, %v911_v11  ;;  %v812_v57 = vadd.f32 %v811_v36, %v788_v7 }
 0x158   :  { %v880_v5 = vmul.f32 %v2138_v21, %v846_v39  ;;  %1232 = vmatmul.bf16.gmra.mxu3 %v927_v41  ;;  %v829_v51 = vmax.f32 %v812_v57, 0.0 }
 0x159   :  { %v739_v43 = vpop.f32.mrf.mxu2 }
 0x15a   :  { %v740_v44 = vadd.f32 %v739_v43, %v2177_v42  ;;  %v763_v45 = vpop.f32.mrf.mxu3  ;;  %v914_v50 = vadd.f32 %v2147_v31, %v880_v5  ;;  %v863_v60 = vmul.f32 %v2184_v52, %v829_v51 }
 0x15b   :  { %v789_v14 = vpop.f32.mrf.mxu0 }
 0x15c   :  { %v790_v48 = vadd.f32 %v789_v14, %v2168_v33  ;;  %v813_v53 = vpop.f32.mrf.mxu1  ;;  %v926_v56 = vpack.c.bf16 %v914_v50, %v910_v47  ;;  %v764_v21 = vadd.f32 %v763_v45, %v740_v44  ;;  %v897_v10 = vadd.f32 %v2189_v61, %v863_v60 }
 0x15e   :  { %v814_v58 = vadd.f32 %v813_v53, %v790_v48  ;;  %1208 = vmatmul.bf16.gmra.mxu2 %v926_v56  ;;  %v828_v31 = vmax.f32 %v764_v21, 0.0 }
 0x160   :  { %v833_v62 = vmax.f32 %v814_v58, 0.0  ;;  %v862_v18 = vmul.f32 %v2192_v2, %v828_v31 }
 0x161   :  { %v741_v63 = vpop.f32.mrf.mxu2 }
 0x162   :  { %v867_v3 = vmul.f32 %v2184_v52, %v833_v62  ;;  %v742_v4 = vadd.f32 %v741_v63, %v2177_v42  ;;  %v765_v6 = vpop.f32.mrf.mxu3  ;;  %v896_v16 = vadd.f32 %v2201_v19, %v862_v18 }
 0x163   :  { %v792_v8 = vpop.f32.mrf.mxu0 }
 0x164   :  { %v901_v12 = vadd.f32 %v2189_v61, %v867_v3  ;;  %v766_v13 = vadd.f32 %v765_v6, %v742_v4  ;;  %v793_v15 = vadd.f32 %v792_v8, %v2168_v33  ;;  %v816_v17 = vpop.f32.mrf.mxu1 }
 0x166   :  { %v921_v59 = vpack.c.bf16 %v901_v12, %v897_v10  ;;  %v832_v20 = vmax.f32 %v766_v13, 0.0  ;;  %v817_v24 = vadd.f32 %v816_v17, %v793_v15 }
 0x168   :  { %v866_v23 = vmul.f32 %v2192_v2, %v832_v20  ;;  %1270 = vmatmul.bf16.vlgmr.msrb.gmra.mxu1 %v921_v59  ;;  %v837_v30 = vmax.f32 %v817_v24, 0.0 }
 0x169   :  { %v744_v25 = vpop.f32.mrf.mxu2 }
 0x16a   :  { %v900_v26 = vadd.f32 %v2201_v19, %v866_v23  ;;  %v745_v54 = vadd.f32 %v744_v25, %v2177_v42  ;;  %v768_v27 = vpop.f32.mrf.mxu3  ;;  %v871_v34 = vmul.f32 %v2184_v52, %v837_v30  ;;  %v1855_v25 = vld [vmem:[%s2272_s10] ss:$0 sm:$0xff] }
 0x16b   :  { %v794_v28 = vpop.f32.mrf.mxu0 }
 0x16c   :  { %v920_v29 = vpack.c.bf16 %v900_v26, %v896_v16  ;;  %v795_v9 = vadd.f32 %v794_v28, %v2168_v33  ;;  %v818_v22 = vpop.f32.mrf.mxu1  ;;  %v769_v55 = vadd.f32 %v768_v27, %v745_v54  ;;  %v905_v38 = vadd.f32 %v2189_v61, %v871_v34 }
 0x16e   :  { %v819_v32 = vadd.f32 %v818_v22, %v795_v9  ;;  %1246 = vmatmul.bf16.vlgmr.msrb.gmra.mxu0 %v920_v29  ;;  %v836_v1 = vmax.f32 %v769_v55, 0.0 }
 0x170   :  { %v841_v35 = vmax.f32 %v819_v32, 0.0  ;;  %v870_v41 = vmul.f32 %v2192_v2, %v836_v1  ;;  %v1857_v32 = vld [vmem:[%s2274_s12] ss:$0 sm:$0xff] }
 0x171   :  { %v746_v0 = vpop.f32.mrf.mxu2 }
 0x172   :  { %v875_v40 = vmul.f32 %v2184_v52, %v841_v35  ;;  %v747_v49 = vadd.f32 %v746_v0, %v2177_v42  ;;  %v770_v46 = vpop.f32.mrf.mxu3  ;;  %v904_v14 = vadd.f32 %v2201_v19, %v870_v41 }
 0x173   :  { %v797_v7 = vpop.f32.mrf.mxu0 }
 0x174   :  { %v771_v36 = vadd.f32 %v770_v46, %v747_v49  ;;  %v798_v11 = vadd.f32 %v797_v7, %v2168_v33  ;;  %v821_v37 = vpop.f32.mrf.mxu1  ;;  %v909_v39 = vadd.f32 %v2189_v61, %v875_v40 }
 0x176   :  { %v840_v5 = vmax.f32 %v771_v36, 0.0  ;;  %v925_v57 = vpack.c.bf16 %v909_v39, %v905_v38  ;;  %v822_v44 = vadd.f32 %v821_v37, %v798_v11 }
 0x178   :  { %v874_v43 = vmul.f32 %v2192_v2, %v840_v5  ;;  %1275 = vmatmul.bf16.gmra.mxu1 %v925_v57  ;;  %v845_v53 = vmax.f32 %v822_v44, 0.0 }
 0x179   :  { %v749_v45 = vpop.f32.mrf.mxu2 }
 0x17a   :  { %v750_v47 = vadd.f32 %v749_v45, %v2177_v42  ;;  %v773_v50 = vpop.f32.mrf.mxu3  ;;  %v908_v51 = vadd.f32 %v2201_v19, %v874_v43  ;;  %v879_v63 = vmul.f32 %v2184_v52, %v845_v53 }
 0x17b   :  { %v799_v48 = vpop.f32.mrf.mxu0 }
 0x17c   :  { %v800_v56 = vadd.f32 %v799_v48, %v2168_v33  ;;  %v924_v21 = vpack.c.bf16 %v908_v51, %v904_v14  ;;  %v823_v58 = vpop.f32.mrf.mxu1  ;;  %v774_v60 = vadd.f32 %v773_v50, %v750_v47  ;;  %v913_v13 = vadd.f32 %v2189_v61, %v879_v63 }
 0x17e   :  { %v824_v62 = vadd.f32 %v823_v58, %v800_v56  ;;  %1251 = vmatmul.bf16.gmra.mxu0 %v924_v21  ;;  %v844_v4 = vmax.f32 %v774_v60, 0.0 }
 0x180   :  { %v849_v31 = vmax.f32 %v824_v62, 0.0  ;;  %v878_v15 = vmul.f32 %v2192_v2, %v844_v4 }
 0x181   :  { %v751_v3 = vpop.f32.mrf.mxu2 }
 0x182   :  { %v883_v6 = vmul.f32 %v2184_v52, %v849_v31  ;;  %v752_v8 = vadd.f32 %v751_v3, %v2177_v42  ;;  %v775_v10 = vpop.f32.mrf.mxu3  ;;  %v912_v20 = vadd.f32 %v2201_v19, %v878_v15 }
 0x184   :  { %v776_v12 = vadd.f32 %v775_v10, %v752_v8  ;;  %v917_v33 = vadd.f32 %v2189_v61, %v883_v6 }
 0x186   :  { %v848_v17 = vmax.f32 %v776_v12, 0.0  ;;  %v929_v18 = vpack.c.bf16 %v917_v33, %v913_v13 }
 0x188   :  { %v882_v59 = vmul.f32 %v2192_v2, %v848_v17  ;;  %1280 = vmatmul.bf16.gmra.mxu1 %v929_v18 }
 0x18a   :  { %v916_v23 = vadd.f32 %v2201_v19, %v882_v59  ;;  %v1856_v19 = vld [vmem:[%s2273_s11] ss:$0 sm:$0xff] }
 0x18c   :  { %v928_v52 = vpack.c.bf16 %v916_v23, %v912_v20 }
 0x18e   :  { %1256 = vmatmul.bf16.gmra.mxu0 %v928_v52 }
 0x1bb   :  { %v1223_v24 = vpop.f32.mrf.mxu3 }
 0x1c1   :  { %v1199_v42 = vpop.f32.mrf.mxu2 }
 0x1c2   :  { %v1200_v26 = vadd.f32 %v1855_v25, %v1199_v42 }
 0x1c3   :  { %v1225_v54 = vpop.f32.mrf.mxu3 }
 0x1c4   :  { %v1224_v27 = vadd.f32 %v1223_v24, %v1200_v26 }
 0x1c9   :  { %v1201_v61 = vpop.f32.mrf.mxu2 }
 0x1ca   :  { %v1202_v9 = vadd.f32 %v1855_v25, %v1201_v61 }
 0x1cb   :  { %v1228_v0 = vpop.f32.mrf.mxu3 }
 0x1cc   :  { %v1226_v35 = vadd.f32 %v1225_v54, %v1202_v9 }
 0x1d1   :  { %v1204_v2 = vpop.f32.mrf.mxu2 }
 0x1d2   :  { %v1205_v46 = vadd.f32 %v1855_v25, %v1204_v2 }
 0x1d3   :  { %v1230_v43 = vpop.f32.mrf.mxu3 }
 0x1d4   :  { %v1229_v39 = vadd.f32 %v1228_v0, %v1205_v46 }
 0x1d9   :  { %v1206_v7 = vpop.f32.mrf.mxu2 }
 0x1da   :  { %v1207_v44 = vadd.f32 %v1855_v25, %v1206_v7 }
 0x1db   :  { %v1233_v62 = vpop.f32.mrf.mxu3 }
 0x1dc   :  { %v1231_v48 = vadd.f32 %v1230_v43, %v1207_v44 }
 0x1e1   :  { %v1209_v47 = vpop.f32.mrf.mxu2 }
 0x1e2   :  { %v1210_v58 = vadd.f32 %v1855_v25, %v1209_v47 }
 0x1e3   :  { %v1235_v17 = vpop.f32.mrf.mxu3 }
 0x1e4   :  { %v1234_v4 = vadd.f32 %v1233_v62, %v1210_v58 }
 0x1e5   :  { %v1271_v16 = vpop.f32.mrf.mxu1 }
 0x1e9   :  { %v1211_v31 = vpop.f32.mrf.mxu2 }
 0x1ea   :  { %v1212_v13 = vadd.f32 %v1855_v25, %v1211_v31 }
 0x1eb   :  { %v1247_v28 = vpop.f32.mrf.mxu0 }
 0x1ec   :  { %v1248_v29 = vadd.f32 %v1247_v28, %v1224_v27  ;;  %v1236_v59 = vadd.f32 %v1235_v17, %v1212_v13 }
 0x1ed   :  { %v1273_v30 = vpop.f32.mrf.mxu1 }
 0x1ee   :  { %v1272_v22 = vadd.f32 %v1271_v16, %v1248_v29 }
 0x1f0   :  { %v1286_v55 = vmax.f32 %v1272_v22, 0.0 }
 0x1f2   :  { %v1296_v34 = vmul.f32 %v1856_v19, %v1286_v55 }
 0x1f3   :  { %v1249_v1 = vpop.f32.mrf.mxu0 }
 0x1f4   :  { %v1306_v40 = vadd.f32 %v1857_v32, %v1296_v34  ;;  %v1250_v49 = vadd.f32 %v1249_v1, %v1226_v35 }
 0x1f5   :  { %v1276_v11 = vpop.f32.mrf.mxu1 }
 0x1f6   :  { %1312 = vst.msk [vmem:[%s2275_s13] sm:$0xff] %vm128_vm0, %v1306_v40  ;;  %v1274_v36 = vadd.f32 %v1273_v30, %v1250_v49 }
 0x1f8   :  { %v1287_v37 = vmax.f32 %v1274_v36, 0.0 }
 0x1fa   :  { %v1297_v38 = vmul.f32 %v1856_v19, %v1287_v37 }
 0x1fb   :  { %v1252_v41 = vpop.f32.mrf.mxu0 }
 0x1fc   :  { %v1307_v5 = vadd.f32 %v1857_v32, %v1297_v38  ;;  %v1253_v57 = vadd.f32 %v1252_v41, %v1229_v39 }
 0x1fd   :  { %v1278_v14 = vpop.f32.mrf.mxu1 }
 0x1fe   :  { %1313 = vst.msk [vmem:[%s2275_s13 + $0x8] sm:$0xff] %vm128_vm0, %v1307_v5  ;;  %v1277_v45 = vadd.f32 %v1276_v11, %v1253_v57 }
 0x200   :  { %v1288_v50 = vmax.f32 %v1277_v45, 0.0 }
 0x202   :  { %v1298_v51 = vmul.f32 %v1856_v19, %v1288_v50 }
 0x203   :  { %v1254_v53 = vpop.f32.mrf.mxu0 }
 0x204   :  { %v1308_v56 = vadd.f32 %v1857_v32, %v1298_v51  ;;  %v1255_v21 = vadd.f32 %v1254_v53, %v1231_v48 }
 0x205   :  { %v1281_v6 = vpop.f32.mrf.mxu1 }
 0x206   :  { %1314 = vst.msk [vmem:[%s2275_s13 + $0x10] sm:$0xff] %vm128_vm0, %v1308_v56  ;;  %v1279_v60 = vadd.f32 %v1278_v14, %v1255_v21 }
 0x208   :  { %v1289_v63 = vmax.f32 %v1279_v60, 0.0 }
 0x20a   :  { %v1299_v3 = vmul.f32 %v1856_v19, %v1289_v63 }
 0x20b   :  { %v1257_v8 = vpop.f32.mrf.mxu0 }
 0x20c   :  { %v1309_v10 = vadd.f32 %v1857_v32, %v1299_v3  ;;  %v1258_v12 = vadd.f32 %v1257_v8, %v1234_v4 }
 0x20d   :  { %v1283_v42 = vpop.f32.mrf.mxu1 }
 0x20e   :  { %1315 = vst.msk [vmem:[%s2275_s13 + $0x18] sm:$0xff] %vm128_vm0, %v1309_v10  ;;  %v1282_v33 = vadd.f32 %v1281_v6, %v1258_v12 }
 0x210   :  { %v1290_v15 = vmax.f32 %v1282_v33, 0.0 }
 0x212   :  { %v1300_v18 = vmul.f32 %v1856_v19, %v1290_v15 }
 0x213   :  { %v1259_v20 = vpop.f32.mrf.mxu0 }
 0x214   :  { %v1310_v23 = vadd.f32 %v1857_v32, %v1300_v18  ;;  %v1260_v52 = vadd.f32 %v1259_v20, %v1236_v59 }
 0x216   :  { %1316 = vst.msk [vmem:[%s2275_s13 + $0x20] sm:$0xff] %vm128_vm0, %v1310_v23  ;;  %v1284_v24 = vadd.f32 %v1283_v42, %v1260_v52 }
 0x218   :  { %v1291_v25 = vmax.f32 %v1284_v24, 0.0 }
 0x21a   :  { %v1301_v61 = vmul.f32 %v1856_v19, %v1291_v25 }
 0x21c   :  { %v1311_v16 = vadd.f32 %v1857_v32, %v1301_v61 }
 0x21e   :  { %1317 = vst.msk [vmem:[%s2275_s13 + $0x28] sm:$0xff] %vm128_vm0, %v1311_v16 }
 0x21f   :  { %1322 = vsyncpa [#allocation3], 1 }
 0x220   :  { %1323 = vsyncpa [#allocation5], 1 }

</bundles_post_ra>
